<compile_context>
chip_gen: v7x
topology: tpu7x:2x2x1
jax: 0.10.0
libtpu: 0.0.40
codegen_flags: <defaults>
</compile_context>

<pallas_src>
import functools
import math

import numpy as np
import jax
import jax.numpy as jnp
from jax.experimental import pallas as pl
from jax.experimental.pallas import tpu as pltpu

# ----------------------------- ResNeSt-50 config -----------------------------
LAYERS = [3, 4, 6, 3]
PLANES = [64, 128, 256, 512]
STRIDES = [1, 2, 2, 2]
IS_FIRST = [False, True, True, True]   # layer1 is built with is_first=False
RADIX = 2
CARDINALITY = 1
BOTTLENECK_WIDTH = 64
STEM_WIDTH = 32
EXPANSION = 4
NUM_CLASSES = 1000
NUM_CLASSES_PAD = 1024                 # pad FC output to a lane-dense multiple of 128
BN_EPS = 1e-5


def _round_up(x, m):
    return (x + m - 1) // m * m


def _vmem_limit_bytes():
    """Generation-aware scoped-VMEM limit (v5e/v6e: 128 MiB, v7x: 64 MiB per core)."""
    cap = 64 * 1024 * 1024
    try:
        cap = int(getattr(pltpu.get_tpu_info(), "vmem_capacity_bytes", cap))
    except Exception:
        pass
    return max(32 * 1024 * 1024, min(cap * 3 // 4, 96 * 1024 * 1024))


_VMEM_LIMIT = _vmem_limit_bytes()


def _pick_tn(n):
    if n % 256 == 0:
        return 256
    if n % 128 == 0:
        return 128
    return n


# ------------------------------ Pallas kernels -------------------------------
def _mm_kernel(a_ref, b_ref, bias_ref, o_ref, *, relu):
    acc = jnp.dot(a_ref[...], b_ref[...], preferred_element_type=jnp.float32)
    acc = acc + bias_ref[...]
    if relu:
        acc = jnp.maximum(acc, 0.0)
    o_ref[...] = acc.astype(o_ref.dtype)


def _mm_res_kernel(a_ref, b_ref, bias_ref, r_ref, o_ref, *, relu):
    acc = jnp.dot(a_ref[...], b_ref[...], preferred_element_type=jnp.float32)
    acc = acc + bias_ref[...] + r_ref[...].astype(jnp.float32)
    if relu:
        acc = jnp.maximum(acc, 0.0)
    o_ref[...] = acc.astype(o_ref.dtype)


def pallas_matmul(a, b, bias, relu=False, residual=None, out_dtype=jnp.bfloat16):
    """(M,K)bf16 @ (K,N)bf16 + bias(N,)f32 [+residual] [+ReLU]; f32 accumulation.

    Grid tiles M and N (both 'parallel'); K is kept whole per block.
    """
    a = a.astype(jnp.bfloat16)
    M, K = a.shape
    N = b.shape[1]
    bias = jnp.asarray(bias, jnp.float32).reshape(1, N)

    if M >= 1024:
        tm = 256
    elif M >= 128:
        tm = 128
    else:
        tm = _round_up(M, 8)
    tn = _pick_tn(N)

    Mp = _round_up(M, tm)
    if Mp != M:
        a = jnp.pad(a, ((0, Mp - M), (0, 0)))
        if residual is not None:
            residual = jnp.pad(residual, ((0, Mp - M), (0, 0)))

    in_specs = [
        pl.BlockSpec((tm, K), lambda i, j: (i, 0)),
        pl.BlockSpec((K, tn), lambda i, j: (0, j)),
        pl.BlockSpec((1, tn), lambda i, j: (0, j)),
    ]
    args = [a, b, bias]
    if residual is not None:
        in_specs.append(pl.BlockSpec((tm, tn), lambda i, j: (i, j)))
        args.append(residual.astype(jnp.bfloat16))
        kern = functools.partial(_mm_res_kernel, relu=relu)
    else:
        kern = functools.partial(_mm_kernel, relu=relu)

    out = pl.pallas_call(
        kern,
        out_shape=jax.ShapeDtypeStruct((Mp, N), out_dtype),
        grid=(Mp // tm, N // tn),
        in_specs=in_specs,
        out_specs=pl.BlockSpec((tm, tn), lambda i, j: (i, j)),
        compiler_params=pltpu.CompilerParams(
            dimension_semantics=("parallel", "parallel"),
            vmem_limit_bytes=_VMEM_LIMIT),
    )(*args)
    return out[:M] if Mp != M else out


def _conv3x3_kernel(x_ref, w_ref, b_ref, o_ref, *, H, Wq, relu):
    """Direct 3x3 stride-1 conv on a flattened, padded activation slab.

    x_ref: (1, (H+3)*Wq, C) bf16 (padded rows/cols, row-major flattened)
    w_ref: (9, C, tn) bf16 ; b_ref: (1, tn) f32 ; o_ref: (1, H*Wq, tn) bf16
    Output columns [W, Wq) of each row are garbage and sliced off by the caller.
    """
    L = H * Wq
    xfull = x_ref[0]                                   # (Hp*Wq, C) bf16
    acc = None
    for di in range(3):
        for dj in range(3):
            off = di * Wq + dj
            tap = xfull[off:off + L, :]                # (L, C) shifted view (VMEM copy)
            prod = jnp.dot(tap, w_ref[di * 3 + dj],
                           preferred_element_type=jnp.float32)
            acc = prod if acc is None else acc + prod
    acc = acc + b_ref[...]
    if relu:
        acc = jnp.maximum(acc, 0.0)
    o_ref[0] = acc.astype(o_ref.dtype)


def conv3x3_direct(x, w9, bias, relu=True):
    """3x3, stride=1, pad=1 conv (+folded BN, +ReLU) without im2col HBM blowup."""
    B, H, W, C = x.shape
    N = w9.shape[2]
    Wq = W + 2
    Hp = H + 3                                          # top 1, bottom 2 rows of padding
    xp = jnp.pad(x, ((0, 0), (1, 2), (1, 1), (0, 0)))
    xflat = xp.reshape(B, Hp * Wq, C)
    tn = _pick_tn(N)
    out = pl.pallas_call(
        functools.partial(_conv3x3_kernel, H=H, Wq=Wq, relu=relu),
        out_shape=jax.ShapeDtypeStruct((B, H * Wq, N), jnp.bfloat16),
        grid=(B, N // tn),
        in_specs=[
            pl.BlockSpec((1, Hp * Wq, C), lambda b, n: (b, 0, 0)),
            pl.BlockSpec((9, C, tn), lambda b, n: (0, 0, n)),
            pl.BlockSpec((1, tn), lambda b, n: (0, n)),
        ],
        out_specs=pl.BlockSpec((1, H * Wq, tn), lambda b, n: (b, 0, n)),
        compiler_params=pltpu.CompilerParams(
            dimension_semantics=("parallel", "parallel"),
            vmem_limit_bytes=_VMEM_LIMIT),
    )(xflat, w9, jnp.asarray(bias, jnp.float32).reshape(1, N))
    out = out.reshape(B, H, Wq, N)[:, :, :W, :]         # drop garbage columns
    return out


def _pool_kernel(p_ref, o_ref, *, op, scale):
    kk = p_ref.shape[0]
    acc = p_ref[0].astype(jnp.float32)
    for t in range(1, kk):
        v = p_ref[t].astype(jnp.float32)
        acc = jnp.maximum(acc, v) if op == "max" else acc + v
    if op != "max":
        acc = acc * scale
    o_ref[...] = acc.astype(o_ref.dtype)


def pool_reduce(patches, op, denom=None):
    """(kk, M, C) -> (M, C): leading-axis max or sum/denom (unrolled VPU reduce)."""
    kk, M, C = patches.shape
    scale = 1.0 / float(denom if denom is not None else kk)
    tm = 512 if M >= 512 else _round_up(M, 8)
    Mp = _round_up(M, tm)
    if Mp != M:
        patches = jnp.pad(patches, ((0, 0), (0, Mp - M), (0, 0)))
    out = pl.pallas_call(
        functools.partial(_pool_kernel, op=op, scale=scale),
        out_shape=jax.ShapeDtypeStruct((Mp, C), jnp.bfloat16),
        grid=(Mp // tm,),
        in_specs=[pl.BlockSpec((kk, tm, C), lambda i: (0, i, 0))],
        out_specs=pl.BlockSpec((tm, C), lambda i: (i, 0)),
        compiler_params=pltpu.CompilerParams(
            dimension_semantics=("parallel",),
            vmem_limit_bytes=_VMEM_LIMIT),
    )(patches)
    return out[:M] if Mp != M else out


def _splat_tail_kernel(x_ref, w1_ref, b1_ref, w2_ref, b2_ref, o_ref, *, radix):
    """Fused gap -> fc1(+bn1,ReLU) -> fc2 -> rSoftMax(radix) -> weighted sum."""
    x = x_ref[...].astype(jnp.float32)                  # (B, R, L, C)
    L = x.shape[2]
    gap = jnp.sum(x, axis=1)                            # (B, L, C)  sum over radix
    gap = jnp.sum(gap, axis=1) * (1.0 / L)              # (B, C)     adaptive avg pool
    g1 = jnp.dot(gap.astype(jnp.bfloat16), w1_ref[...],
                 preferred_element_type=jnp.float32) + b1_ref[...]
    g1 = jnp.maximum(g1, 0.0).astype(jnp.bfloat16)      # (B, inter)
    logits = []
    for r in range(radix):
        lg = jnp.dot(g1, w2_ref[r], preferred_element_type=jnp.float32) + b2_ref[r]
        logits.append(lg)                               # (B, C) per radix
    m = logits[0]
    for r in range(1, radix):
        m = jnp.maximum(m, logits[r])
    exps = [jnp.exp(lg - m) for lg in logits]
    s = exps[0]
    for r in range(1, radix):
        s = s + exps[r]
    inv_s = pl.reciprocal(s, approx=True)               # EUP, once per row
    acc = x[:, 0] * (exps[0] * inv_s)[:, None, :]
    for r in range(1, radix):
        acc = acc + x[:, r] * (exps[r] * inv_s)[:, None, :]
    o_ref[...] = acc.astype(o_ref.dtype)


def splat_tail(splited, p):
    B, R, L, C = splited.shape
    return pl.pallas_call(
        functools.partial(_splat_tail_kernel, radix=R),
        out_shape=jax.ShapeDtypeStruct((B, L, C), jnp.bfloat16),
        in_specs=[pl.BlockSpec(memory_space=pltpu.MemorySpace.VMEM)] * 5,
        out_specs=pl.BlockSpec(memory_space=pltpu.MemorySpace.VMEM),
        compiler_params=pltpu.CompilerParams(vmem_limit_bytes=_VMEM_LIMIT),
    )(splited, p["fc1_w"], p["fc1_b"], p["fc2_w"], p["fc2_b"])


# --------------------------------- JAX glue -----------------------------------
def extract_patch_stack(x, k, stride, padding, pad_value=0.0):
    """NHWC -> (k*k, B*OH*OW, C) stacked on the leading (tap) axis."""
    B, H, W, C = x.shape
    if padding > 0:
        x = jnp.pad(x, ((0, 0), (padding, padding), (padding, padding), (0, 0)),
                    constant_values=pad_value)
    OH = (H + 2 * padding - k) // stride + 1
    OW = (W + 2 * padding - k) // stride + 1
    cols = []
    for i in range(k):
        for j in range(k):
            cols.append(x[:, i:i + stride * (OH - 1) + 1:stride,
                          j:j + stride * (OW - 1) + 1:stride, :].reshape(B * OH * OW, C))
    return jnp.stack(cols, axis=0), OH, OW


def conv_im2col(x, p, stride, padding, relu):
    """Generic conv via im2col + Pallas matmul (used only for the tiny 3-channel stem conv)."""
    B, H, W, C = x.shape
    k = p["k"]
    patches, OH, OW = extract_patch_stack(x, k, stride, padding)
    M = B * OH * OW
    a = jnp.transpose(patches, (1, 0, 2)).reshape(M, k * k * C)   # (kh, kw, cin) order
    o = pallas_matmul(a, p["w"][0], p["b"][0], relu=relu)
    return o.reshape(B, OH, OW, -1)


def conv1x1(x, p, relu, residual=None, out_dtype=jnp.bfloat16):
    B, H, W, C = x.shape
    o = pallas_matmul(x.reshape(B * H * W, C), p["w"][0], p["b"][0],
                      relu=relu, residual=residual, out_dtype=out_dtype)
    return o.reshape(B, H, W, -1)


def conv3x3_bn_act(x, p, relu=True):
    B, H, W, C = x.shape
    cout = p["w"][0].shape[1]
    return conv3x3_direct(x, p["w"][0].reshape(9, C, cout), p["b"][0], relu=relu)


def max_pool(x, k, stride, padding):
    B, _, _, C = x.shape
    patches, OH, OW = extract_patch_stack(x, k, stride, padding,
                                          pad_value=float("-inf"))
    out = pool_reduce(patches, "max")
    return out.reshape(B, OH, OW, C)


def avg_pool(x, k, stride, padding):
    # count_include_pad=True semantics (PyTorch AvgPool2d default): denom = k*k.
    B, _, _, C = x.shape
    patches, OH, OW = extract_patch_stack(x, k, stride, padding, pad_value=0.0)
    out = pool_reduce(patches, "mean", denom=k * k)
    return out.reshape(B, OH, OW, C)


def global_avg_pool(x):
    B, H, W, C = x.shape
    patches = jnp.transpose(x.reshape(B, H * W, C), (1, 0, 2))    # (L, B, C)
    return pool_reduce(patches, "mean", denom=H * W)              # (B, C)


# --------------------------- deterministic parameters --------------------------
class ParamGen:
    def __init__(self, seed=0):
        self.rng = np.random.default_rng(seed)

    def normal(self, shape, std):
        return self.rng.normal(0.0, std, size=shape).astype(np.float32)

    def uniform(self, shape, lo, hi):
        return self.rng.uniform(lo, hi, size=shape).astype(np.float32)


def bn_fold(pg, c):
    """Eval-mode BatchNorm folded to (scale, shift)."""
    gamma = 1.0 + pg.normal((c,), 0.1)
    beta = pg.normal((c,), 0.1)
    mean = pg.normal((c,), 0.1)
    var = pg.uniform((c,), 0.5, 1.5)
    scale = gamma / np.sqrt(var + BN_EPS)
    shift = beta - scale * mean
    return scale.astype(np.float32), shift.astype(np.float32)


def make_conv_bn(pg, cin, cout, k, groups=1):
    """Conv2d(bias=False, groups) + folded BN, stored per group as bf16
    (k*k*cin_g, cout_g) matmul weights (im2col order: kh, kw, cin); shift is f32."""
    cin_g, cout_g = cin // groups, cout // groups
    w = pg.normal((cout, cin_g, k, k), math.sqrt(2.0 / (cin_g * k * k)))
    scale, shift = bn_fold(pg, cout)
    w = w * scale[:, None, None, None]
    ws, bs = [], []
    for g in range(groups):
        wg = w[g * cout_g:(g + 1) * cout_g]                       # (cout_g, cin_g, k, k)
        wmat = np.transpose(wg, (2, 3, 1, 0)).reshape(k * k * cin_g, cout_g)
        ws.append(jnp.asarray(wmat, jnp.bfloat16))
        bs.append(jnp.asarray(shift[g * cout_g:(g + 1) * cout_g].reshape(1, -1),
                              jnp.float32))
    return {"k": k, "groups": groups, "w": ws, "b": bs}


def make_splat(pg, in_ch, channels):
    """SplAtConv2d(in_ch, channels, 3, radix=2, cardinality=1) parameters."""
    inter = max(in_ch * RADIX // 4, 32)                           # reduction_factor = 4
    conv = make_conv_bn(pg, in_ch, channels * RADIX, 3, groups=CARDINALITY * RADIX)
    # fc1: 1x1 conv (bias=True) followed by bn1 -> fold
    w1 = pg.normal((inter, channels), math.sqrt(2.0 / channels))
    b1 = pg.normal((inter,), 0.01)
    s1, sh1 = bn_fold(pg, inter)
    fc1_w = (w1 * s1[:, None]).T                                  # (channels, inter)
    fc1_b = s1 * b1 + sh1                                         # (inter,)
    # fc2: 1x1 conv (bias=True), no bn; stored split per radix: (R, inter, channels)
    w2 = pg.normal((channels * RADIX, inter), math.sqrt(2.0 / inter))
    b2 = pg.normal((channels * RADIX,), 0.01)
    fc2_w = np.transpose(w2.reshape(RADIX, channels, inter), (0, 2, 1))
    fc2_b = b2.reshape(RADIX, 1, channels)
    return {"conv": conv, "channels": channels,
            "fc1_w": jnp.asarray(fc1_w, jnp.bfloat16),
            "fc1_b": jnp.asarray(fc1_b.reshape(1, -1), jnp.float32),
            "fc2_w": jnp.asarray(fc2_w, jnp.bfloat16),
            "fc2_b": jnp.asarray(fc2_b, jnp.float32)}


def make_bottleneck(pg, inplanes, planes, stride, has_down, use_avd):
    group_width = int(planes * (BOTTLENECK_WIDTH / 64.0)) * CARDINALITY
    p = {"avd": use_avd, "stride": stride}
    p["conv1"] = make_conv_bn(pg, inplanes, group_width, 1)            # conv1 + bn1
    p["splat"] = make_splat(pg, group_width, group_width)              # conv2 (SplAt)
    p["conv3"] = make_conv_bn(pg, group_width, planes * EXPANSION, 1)  # conv3 + bn3
    if has_down:                                                       # avg_down downsample
        p["down_pool_k"] = stride
        p["down_conv"] = make_conv_bn(pg, inplanes, planes * EXPANSION, 1)
    else:
        p["down_conv"] = None
    return p


def build_resnest50(seed=0):
    pg = ParamGen(seed)
    params = {"stem": [make_conv_bn(pg, 3, STEM_WIDTH, 3),
                       make_conv_bn(pg, STEM_WIDTH, STEM_WIDTH, 3),
                       make_conv_bn(pg, STEM_WIDTH, STEM_WIDTH * 2, 3)]}
    inplanes = STEM_WIDTH * 2
    stages = []
    for planes, nblocks, stride, is_first in zip(PLANES, LAYERS, STRIDES, IS_FIRST):
        blocks = []
        has_down = (stride != 1) or (inplanes != planes * EXPANSION)
        blocks.append(make_bottleneck(pg, inplanes, planes, stride, has_down,
                                      use_avd=(stride > 1 or is_first)))
        inplanes = planes * EXPANSION
        for _ in range(1, nblocks):
            blocks.append(make_bottleneck(pg, inplanes, planes, 1, False, False))
        stages.append(blocks)
    params["stages"] = stages
    # classifier, padded 1000 -> 1024 for a lane-dense output store
    wf = pg.normal((NUM_CLASSES, 512 * EXPANSION), 0.01)
    bf = pg.normal((NUM_CLASSES,), 0.01)
    wf_pad = np.zeros((512 * EXPANSION, NUM_CLASSES_PAD), np.float32)
    wf_pad[:, :NUM_CLASSES] = wf.T
    bf_pad = np.zeros((NUM_CLASSES_PAD,), np.float32)
    bf_pad[:NUM_CLASSES] = bf
    params["fc_w"] = jnp.asarray(wf_pad, jnp.bfloat16)
    params["fc_b"] = jnp.asarray(bf_pad.reshape(1, -1), jnp.float32)
    return params


# --------------------------------- forward ------------------------------------
def splat_forward(x, p):
    """SplAtConv2d forward (3x3, stride=1 — with avd the stride moves to the pool)."""
    B, H, W, Cin = x.shape
    C = p["channels"]
    cin_g = Cin // RADIX
    outs = []
    for r in range(RADIX):
        xr = x[..., r * cin_g:(r + 1) * cin_g]                     # per-group input slice
        w9 = p["conv"]["w"][r].reshape(9, cin_g, C)
        o = conv3x3_direct(xr, w9, p["conv"]["b"][r], relu=True)   # conv + bn0 + relu
        outs.append(o.reshape(B, H * W, C))
    splited = jnp.stack(outs, axis=1)                              # (B, radix, L, C)
    out = splat_tail(splited, p)                                   # fused attention tail
    return out.reshape(B, H, W, C)


def bottleneck_forward(x, p):
    out = conv1x1(x, p["conv1"], relu=True)
    out = splat_forward(out, p["splat"])
    if p["avd"]:                                                   # avd, avd_first=False
        out = avg_pool(out, 3, p["stride"], 1)
    if p["down_conv"] is not None:
        r = x
        if p["down_pool_k"] > 1:
            r = avg_pool(r, p["down_pool_k"], p["down_pool_k"], 0)
        residual = conv1x1(r, p["down_conv"], relu=False)
    else:
        residual = x
    # conv3 + bn3 + residual add + ReLU fused in one matmul epilogue
    B, H, W, C = out.shape
    Cout = residual.shape[-1]
    y = pallas_matmul(out.reshape(B * H * W, C), p["conv3"]["w"][0], p["conv3"]["b"][0],
                      relu=True, residual=residual.reshape(B * H * W, Cout))
    return y.reshape(B, H, W, Cout)


def resnest50_forward(x_nchw, params):
    x = jnp.transpose(jnp.asarray(x_nchw, jnp.float32), (0, 2, 3, 1))   # NCHW -> NHWC
    x = x.astype(jnp.bfloat16)
    # deep stem: conv(s2)+bn+relu, conv+bn+relu, conv+bn+relu, maxpool 3x3/2
    x = conv_im2col(x, params["stem"][0], stride=2, padding=1, relu=True)
    x = conv3x3_bn_act(x, params["stem"][1], relu=True)
    x = conv3x3_bn_act(x, params["stem"][2], relu=True)
    x = max_pool(x, 3, 2, 1)
    for blocks in params["stages"]:
        for bp in blocks:
            x = bottleneck_forward(x, bp)
    feat = global_avg_pool(x)                                           # (B, 2048)
    logits = pallas_matmul(feat, params["fc_w"], params["fc_b"],
                           relu=False, out_dtype=jnp.float32)
    return logits[:, :NUM_CLASSES]


if __name__ == "__main__":
    key = jax.random.PRNGKey(0)
    # ResNeSt-50 expects NCHW input; spatial 64 instead of 224 keeps the run small.
    x = jax.random.normal(key, (1, 3, 64, 64), dtype=jnp.float32)
    params = build_resnest50(seed=0)
    logits = resnest50_forward(x, params)
    logits = jax.block_until_ready(logits)
    assert logits.shape == (1, NUM_CLASSES)
    assert bool(jnp.all(jnp.isfinite(logits)))
    print("KERNEL_OK")
</pallas_src>

<mosaic_0001>
module attributes {stable_mosaic.version = 11 : i64} {
  func.func @_mm_kernel(%arg0: i32, %arg1: i32, %arg2: memref<256x27xbf16, #tpu.memory_space<vmem>>, %arg3: memref<27x32xbf16, #tpu.memory_space<vmem>>, %arg4: memref<1x32xf32, #tpu.memory_space<vmem>>, %arg5: memref<256x32xbf16, #tpu.memory_space<vmem>>) attributes {dimension_semantics = [#tpu.dimension_semantics<parallel>, #tpu.dimension_semantics<parallel>], iteration_bounds = array<i64: 4, 1>, scalar_prefetch = 0 : i64, scratch_operands = 0 : i64, tpu.core_type = #tpu.core_type<tc>, window_params = [{transform_indices = @transform_0, window_bounds = array<i64: 256, 27>}, {transform_indices = @transform_1, window_bounds = array<i64: 27, 32>}, {transform_indices = @transform_2, window_bounds = array<i64: 1, 32>}, {transform_indices = @transform_3, window_bounds = array<i64: 256, 32>}]} {
    %c0 = arith.constant 0 : index
    %c0_0 = arith.constant 0 : index
    %0 = vector.load %arg2[%c0, %c0_0] : memref<256x27xbf16, #tpu.memory_space<vmem>>, vector<256x27xbf16>
    %c0_1 = arith.constant 0 : index
    %c0_2 = arith.constant 0 : index
    %1 = vector.load %arg3[%c0_1, %c0_2] : memref<27x32xbf16, #tpu.memory_space<vmem>>, vector<27x32xbf16>
    %cst = arith.constant dense<0.000000e+00> : vector<256x32xf32>
    %2 = tpu.matmul %0, %1, %cst {dimension_numbers = #tpu.dot_dimension_numbers<[1], [0], [0], [1], [0, 0, 1, 1], [], []>} : vector<256x27xbf16>, vector<27x32xbf16>, vector<256x32xf32> -> vector<256x32xf32>
    %c0_3 = arith.constant 0 : index
    %c0_4 = arith.constant 0 : index
    %3 = vector.load %arg4[%c0_3, %c0_4] : memref<1x32xf32, #tpu.memory_space<vmem>>, vector<1x32xf32>
    %4 = vector.broadcast %3 : vector<1x32xf32> to vector<256x32xf32>
    %5 = arith.addf %2, %4 : vector<256x32xf32>
    %cst_5 = arith.constant 0.000000e+00 : f32
    %6 = vector.broadcast %cst_5 : f32 to vector<256x32xf32>
    %7 = arith.maximumf %5, %6 : vector<256x32xf32>
    %8 = arith.truncf %7 : vector<256x32xf32> to vector<256x32xbf16>
    %c0_6 = arith.constant 0 : index
    %c0_7 = arith.constant 0 : index
    %9 = vector.load %arg5[%c0_6, %c0_7] : memref<256x32xbf16, #tpu.memory_space<vmem>>, vector<256x32xbf16>
    tpu.vector_store %arg5[%c0_6, %c0_7], %8 {strides = array<i32>} : memref<256x32xbf16, #tpu.memory_space<vmem>>, vector<256x32xbf16>,
    return
  }
  func.func @transform_0(%arg0: i32, %arg1: i32) -> (i32, i32) {
    %c0_i32 = arith.constant 0 : i32
    %c0_i32_0 = arith.constant 0 : i32
    return %arg0, %c0_i32 : i32, i32
  }
  func.func @transform_1(%arg0: i32, %arg1: i32) -> (i32, i32) {
    %c0_i32 = arith.constant 0 : i32
    %c0_i32_0 = arith.constant 0 : i32
    return %c0_i32, %arg1 : i32, i32
  }
  func.func @transform_2(%arg0: i32, %arg1: i32) -> (i32, i32) {
    %c0_i32 = arith.constant 0 : i32
    %c0_i32_0 = arith.constant 0 : i32
    return %c0_i32, %arg1 : i32, i32
  }
  func.func @transform_3(%arg0: i32, %arg1: i32) -> (i32, i32) {
    %c0_i32 = arith.constant 0 : i32
    return %arg0, %arg1 : i32, i32
  }
}

</mosaic_0001>

<bundles_post_ra>
// kernel: tpu_custom_call.1
= control target key start
LH: loop header
LB: loop body
LE: loop exit
PB: predicated region body
PF: predicated region fallthrough
CT: control target
= control target key end

     0   :  { %s1130_s12 = smov 0   ;;  %s1132_s13 = smov 0   ;;  %s1313_s0 = inlined_call_operand.vmem [shape: bf16[1024,27], index: 0, kind: input, shape index: {}]   ;;  %s1314_s1 = inlined_call_operand.vmem [shape: bf16[27,32], index: 1, kind: input, shape index: {}]   ;;  %s1315_s2 = inlined_call_operand.vmem [shape: f32[1,32], index: 2, kind: input, shape index: {}]   ;;  %s1316_s3 = inlined_call_operand.vmem [shape: bf16[1024,32], index: 3, kind: output, shape index: {}]  }
   0x1   :  { %s1134_s14 = smov 0  }
   0x2 LB: > { %s25_s15 = sadd.s32 1, %s1103_s13  ;;  %p878_p0 = scmp.ge.s32.totalorder %s1107_s14, 1  ;;  %s1107_s14 = sphi %s1134_s14, %s13_s14   ;;  %s1103_s13 = sphi %s1132_s13, %s1318_s13   ;;  %s1099_s12 = sphi %s1130_s12, %s1317_s12  }
   0x3   : > { %p27_p1 = scmp.ge.s32.totalorder %s25_s15, 4  ;;  %p169_p2 = scmp.lt.s32.totalorder %s1107_s14, 5 }
   0x5   : > { %s1320_s15 = smov (%p27_p1, %s25_s15), 0  ;;  %p170_p3 = pnand %p878_p0, %p169_p2 }
   0x6   : > { %v1067_v0 = vld [vmem:[%s1314_s1] sm:$0xff] (!%p170_p3)   ;;  %vm409_vm0 = vcmask (!%p170_p3), 1044480   ;;  %v1068_v1 = vld [vmem:[%s1314_s1 + $0x8] sm:$0x3f] (!%p170_p3)   ;;  %vm410_vm1 = vcmask (!%p170_p3), 1045504   ;;  %s879_s20 = sshll.u32 (!%p170_p3), %s1099_s12, 5 }
   0x7   : > { %173 = sbr.rel (%p170_p3) target bundleno = 266 (0x10a), region = 32  ;;  %1002 = vmatprep.subr.bf16.mxu0 (!%p170_p3), %v1067_v0  ;;  %1038 = vmatprep.subr.bf16.mxu1 (!%p170_p3), %v1067_v0  ;;  %v1109_v2 = vmov (!%p170_p3), 65535   ;;  %p204_p4 = scmp.lt.s32.totalorder (!%p170_p3), %s879_s20, 127  ;;  %vm360_vm2 = vcmask (!%p170_p3), 220160   ;;  %v1199_v22 = vld [vmem:[%s1315_s2] ss:$0 sm:$0xff] (!%p170_p3) }
   0x8   : > { %1003 = vmatpush3.bf16.msra.mxu0 (!%p170_p3), %v1067_v0  ;;  %1040 = vmatpush3.bf16.msra.mxu1 (!%p170_p3), %v1067_v0  ;;  %v411_v3 = vsel (!%p170_p3), %vm409_vm0, 4294967295, %v1109_v2  ;;  %vm737_vm3 = vcmask (!%p170_p3), 257024  }
   0x9   : > { %v412_v4 = vsel (!%p170_p3), %vm410_vm1, %v411_v3, 0 }
   0xa   : > { %v414_v5 = vand.u32 (!%p170_p3), %v1068_v1, %v412_v4 }
   0xc   : > { %1004 = vmatprep.subr.bf16.mxu0 (!%p170_p3), %v414_v5  ;;  %1039 = vmatprep.subr.bf16.mxu1 (!%p170_p3), %v414_v5 }
   0xd   : > { %1005 = vmatpush3.bf16.msra.mxu0 (!%p170_p3), %v414_v5  ;;  %1041 = vmatpush3.bf16.msra.mxu1 (!%p170_p3), %v414_v5 }
   0xe   : > { %s1322_s20 = smov (!%p204_p4, %s879_s20), 127 }
   0xf   : > { %s880_s21 = sshll.u32 %s1322_s20, 2 }
  0x10   : > { %s1162_s24 = scalar_lea.vmem %s1313_s0, %s880_s21  ;;  %s1211_s29 = scalar_lea.vmem %s1316_s3, %s880_s21 }
  0x11   : > { %v1069_v6 = vld [vmem:[%s1162_s24] sm:$0xff]   ;;  %v1071_v8 = vld [vmem:[%s1162_s24 + $0x8] sm:$0xff]   ;;  %v1073_v10 = vld [vmem:[%s1162_s24 + $0x10] sm:$0xff]  }
  0x12   : > { %v1070_v7 = vld [vmem:[%s1162_s24 + $0x40] sm:$0xff]   ;;  %1006 = vmatprep.mubr.msk.bf16.mxu0 %vm360_vm2, %v1069_v6  ;;  %v1072_v9 = vld [vmem:[%s1162_s24 + $0x48] sm:$0xff]   ;;  %v1074_v11 = vld [vmem:[%s1162_s24 + $0x50] sm:$0xff]  }
  0x13   : > { %1022 = vmatprep.mubr.msk.bf16.mxu1 %vm360_vm2, %v1070_v7  ;;  %1007 = vmatmul.mubr.msk.bf16.vlgmr.msra.gmra.mrb[0].mxu0 %vm360_vm2, %v1071_v8  ;;  %v1075_v12 = vld [vmem:[%s1162_s24 + $0x18] sm:$0xff]   ;;  %v1077_v14 = vld [vmem:[%s1162_s24 + $0x20] sm:$0xff]   ;;  %v1079_v16 = vld [vmem:[%s1162_s24 + $0x28] sm:$0xff]  }
  0x14   : > { %1023 = vmatmul.mubr.msk.bf16.vlgmr.msra.gmra.mrb[0].mxu1 %vm360_vm2, %v1072_v9  ;;  %1010 = vmatprep.mubr.msk.bf16.mxu0 %vm360_vm2, %v1073_v10  ;;  %v1076_v13 = vld [vmem:[%s1162_s24 + $0x58] sm:$0xff]   ;;  %v1078_v15 = vld [vmem:[%s1162_s24 + $0x60] sm:$0xff]   ;;  %v1080_v17 = vld [vmem:[%s1162_s24 + $0x68] sm:$0xff]  }
  0x15   : > { %1026 = vmatprep.mubr.msk.bf16.mxu1 %vm360_vm2, %v1074_v11  ;;  %v1081_v18 = vld [vmem:[%s1162_s24 + $0x30] sm:$0xff]   ;;  %v1083_v20 = vld [vmem:[%s1162_s24 + $0x38] sm:$0xff]  }
  0x16   : > { %v1082_v19 = vld [vmem:[%s1162_s24 + $0x70] sm:$0xff]   ;;  %v1084_v21 = vld [vmem:[%s1162_s24 + $0x78] sm:$0xff]  }
  0x1b   : > { %1011 = vmatmul.mubr.msk.bf16.gmra.mrb[4].mxu0 %vm360_vm2, %v1075_v12 }
  0x1c   : > { %1027 = vmatmul.mubr.msk.bf16.gmra.mrb[4].mxu1 %vm360_vm2, %v1076_v13  ;;  %1014 = vmatprep.mubr.msk.bf16.mxu0 %vm360_vm2, %v1077_v14 }
  0x1d   : > { %1030 = vmatprep.mubr.msk.bf16.mxu1 %vm360_vm2, %v1078_v15 }
  0x23   : > { %1015 = vmatmul.mubr.msk.bf16.gmra.mrb[8].mxu0 %vm360_vm2, %v1079_v16 }
  0x24   : > { %1031 = vmatmul.mubr.msk.bf16.gmra.mrb[8].mxu1 %vm360_vm2, %v1080_v17  ;;  %1018 = vmatprep.mubr.msk.bf16.mxu0 %vm360_vm2, %v1081_v18 }
  0x25   : > { %1034 = vmatprep.mubr.msk.bf16.mxu1 %vm360_vm2, %v1082_v19 }
  0x2b   : > { %1019 = vmatmul.mubr.msk.bf16.gmra.mrb[12].mxu0 %vm360_vm2, %v1083_v20 }
  0x2c   : > { %1035 = vmatmul.mubr.msk.bf16.gmra.mrb[12].mxu1 %vm360_vm2, %v1084_v21 }
  0xe6   : > { %v1008_v23 = vpop.f32.mrb[0].mxu0 }
  0xe7   : > { %v459_v24 = vadd.f32 %v1008_v23, %v1199_v22  ;;  %v1024_v25 = vpop.f32.mrb[0].mxu1  ;;  %v450_v26 = vpop.f32.mrb[1].mxu0 }
  0xe8   : > { %v523_v27 = vadd.f32 %v1024_v25, %v1199_v22  ;;  %v451_v28 = vadd.f32 %v1199_v22, %v450_v26  ;;  %v514_v29 = vpop.f32.mrb[1].mxu1  ;;  %v1009_v30 = vpop.f32.mrb[2].mxu0 }
  0xe9   : > { %v579_v31 = vmax.f32 %v459_v24, 0.0  ;;  %v515_v32 = vadd.f32 %v1199_v22, %v514_v29  ;;  %v462_v33 = vadd.f32 %v1009_v30, %v1199_v22  ;;  %v1025_v34 = vpop.f32.mrb[2].mxu1  ;;  %v453_v35 = vpop.f32.mrb[3].mxu0 }
  0xea   : > { %v595_v36 = vmax.f32 %v523_v27, 0.0  ;;  %v577_v37 = vmax.f32 %v451_v28, 0.0  ;;  %v526_v38 = vadd.f32 %v1025_v34, %v1199_v22  ;;  %v454_v39 = vadd.f32 %v1199_v22, %v453_v35  ;;  %v517_v40 = vpop.f32.mrb[3].mxu1 }
  0xeb   : > { %v954_v41 = vpack.c.bf16 %v579_v31, %v579_v31  ;;  %v593_v42 = vmax.f32 %v515_v32, 0.0  ;;  %v580_v43 = vmax.f32 %v462_v33, 0.0  ;;  %v518_v44 = vadd.f32 %v1199_v22, %v517_v40 }
  0xec   : > { %v970_v45 = vpack.c.bf16 %v595_v36, %v595_v36  ;;  %v952_v46 = vpack.c.bf16 %v577_v37, %v577_v37  ;;  %v596_v47 = vmax.f32 %v526_v38, 0.0  ;;  %v578_v48 = vmax.f32 %v454_v39, 0.0 }
  0xed   : > { %740 = vst.msk [vmem:[%s1211_s29 + $0x8] sm:$0xf] %vm737_vm3, %v954_v41  ;;  %v968_v49 = vpack.c.bf16 %v593_v42, %v593_v42  ;;  %v955_v50 = vpack.c.bf16 %v580_v43, %v580_v43  ;;  %v594_v51 = vmax.f32 %v518_v44, 0.0 }
  0xee   : > { %756 = vst.msk [vmem:[%s1211_s29 + $0x48] sm:$0xf] %vm737_vm3, %v970_v45  ;;  %738 = vst.msk [vmem:[%s1211_s29] sm:$0xf] %vm737_vm3, %v952_v46  ;;  %v971_v52 = vpack.c.bf16 %v596_v47, %v596_v47  ;;  %v953_v53 = vpack.c.bf16 %v578_v48, %v578_v48  ;;  %v1012_v54 = vpop.f32.mrb[4].mxu0 }
  0xef   : > { %754 = vst.msk [vmem:[%s1211_s29 + $0x40] sm:$0xf] %vm737_vm3, %v968_v49  ;;  %741 = vst.msk [vmem:[%s1211_s29 + $0xc] sm:$0xf] %vm737_vm3, %v955_v50  ;;  %v969_v55 = vpack.c.bf16 %v594_v51, %v594_v51  ;;  %v475_v56 = vadd.f32 %v1012_v54, %v1199_v22  ;;  %v1028_v57 = vpop.f32.mrb[4].mxu1  ;;  %v466_v58 = vpop.f32.mrb[5].mxu0 }
  0xf0   : > { %757 = vst.msk [vmem:[%s1211_s29 + $0x4c] sm:$0xf] %vm737_vm3, %v971_v52  ;;  %739 = vst.msk [vmem:[%s1211_s29 + $0x4] sm:$0xf] %vm737_vm3, %v953_v53  ;;  %v539_v59 = vadd.f32 %v1028_v57, %v1199_v22  ;;  %v467_v60 = vadd.f32 %v1199_v22, %v466_v58  ;;  %v530_v61 = vpop.f32.mrb[5].mxu1  ;;  %v1013_v62 = vpop.f32.mrb[6].mxu0 }
  0xf1   : > { %755 = vst.msk [vmem:[%s1211_s29 + $0x44] sm:$0xf] %vm737_vm3, %v969_v55  ;;  %v583_v63 = vmax.f32 %v475_v56, 0.0  ;;  %v531_v0 = vadd.f32 %v1199_v22, %v530_v61  ;;  %v478_v1 = vadd.f32 %v1013_v62, %v1199_v22  ;;  %v1029_v2 = vpop.f32.mrb[6].mxu1  ;;  %v469_v3 = vpop.f32.mrb[7].mxu0 }
  0xf2   : > { %v599_v4 = vmax.f32 %v539_v59, 0.0  ;;  %v581_v5 = vmax.f32 %v467_v60, 0.0  ;;  %v542_v6 = vadd.f32 %v1029_v2, %v1199_v22  ;;  %v470_v7 = vadd.f32 %v1199_v22, %v469_v3  ;;  %v533_v8 = vpop.f32.mrb[7].mxu1 }
  0xf3   : > { %v958_v9 = vpack.c.bf16 %v583_v63, %v583_v63  ;;  %v597_v10 = vmax.f32 %v531_v0, 0.0  ;;  %v584_v11 = vmax.f32 %v478_v1, 0.0  ;;  %v534_v12 = vadd.f32 %v1199_v22, %v533_v8 }
  0xf4   : > { %v974_v13 = vpack.c.bf16 %v599_v4, %v599_v4  ;;  %v956_v14 = vpack.c.bf16 %v581_v5, %v581_v5  ;;  %v600_v15 = vmax.f32 %v542_v6, 0.0  ;;  %v582_v16 = vmax.f32 %v470_v7, 0.0 }
  0xf5   : > { %744 = vst.msk [vmem:[%s1211_s29 + $0x18] sm:$0xf] %vm737_vm3, %v958_v9  ;;  %v972_v17 = vpack.c.bf16 %v597_v10, %v597_v10  ;;  %v959_v18 = vpack.c.bf16 %v584_v11, %v584_v11  ;;  %v598_v19 = vmax.f32 %v534_v12, 0.0 }
  0xf6   : > { %760 = vst.msk [vmem:[%s1211_s29 + $0x58] sm:$0xf] %vm737_vm3, %v974_v13  ;;  %742 = vst.msk [vmem:[%s1211_s29 + $0x10] sm:$0xf] %vm737_vm3, %v956_v14  ;;  %v975_v20 = vpack.c.bf16 %v600_v15, %v600_v15  ;;  %v957_v21 = vpack.c.bf16 %v582_v16, %v582_v16  ;;  %v1016_v23 = vpop.f32.mrb[8].mxu0 }
  0xf7   : > { %758 = vst.msk [vmem:[%s1211_s29 + $0x50] sm:$0xf] %vm737_vm3, %v972_v17  ;;  %745 = vst.msk [vmem:[%s1211_s29 + $0x1c] sm:$0xf] %vm737_vm3, %v959_v18  ;;  %v973_v24 = vpack.c.bf16 %v598_v19, %v598_v19  ;;  %v491_v25 = vadd.f32 %v1016_v23, %v1199_v22  ;;  %v1032_v26 = vpop.f32.mrb[8].mxu1  ;;  %v482_v27 = vpop.f32.mrb[9].mxu0 }
  0xf8   : > { %761 = vst.msk [vmem:[%s1211_s29 + $0x5c] sm:$0xf] %vm737_vm3, %v975_v20  ;;  %743 = vst.msk [vmem:[%s1211_s29 + $0x14] sm:$0xf] %vm737_vm3, %v957_v21  ;;  %v555_v28 = vadd.f32 %v1032_v26, %v1199_v22  ;;  %v483_v29 = vadd.f32 %v1199_v22, %v482_v27  ;;  %v546_v30 = vpop.f32.mrb[9].mxu1  ;;  %v1017_v31 = vpop.f32.mrb[10].mxu0 }
  0xf9   : > { %759 = vst.msk [vmem:[%s1211_s29 + $0x54] sm:$0xf] %vm737_vm3, %v973_v24  ;;  %v587_v32 = vmax.f32 %v491_v25, 0.0  ;;  %v547_v33 = vadd.f32 %v1199_v22, %v546_v30  ;;  %v494_v34 = vadd.f32 %v1017_v31, %v1199_v22  ;;  %v1033_v35 = vpop.f32.mrb[10].mxu1  ;;  %v485_v36 = vpop.f32.mrb[11].mxu0 }
  0xfa   : > { %v603_v37 = vmax.f32 %v555_v28, 0.0  ;;  %v585_v38 = vmax.f32 %v483_v29, 0.0  ;;  %v558_v39 = vadd.f32 %v1033_v35, %v1199_v22  ;;  %v486_v40 = vadd.f32 %v1199_v22, %v485_v36  ;;  %v549_v41 = vpop.f32.mrb[11].mxu1 }
  0xfb   : > { %v962_v42 = vpack.c.bf16 %v587_v32, %v587_v32  ;;  %v601_v43 = vmax.f32 %v547_v33, 0.0  ;;  %v588_v44 = vmax.f32 %v494_v34, 0.0  ;;  %v550_v45 = vadd.f32 %v1199_v22, %v549_v41 }
  0xfc   : > { %v978_v46 = vpack.c.bf16 %v603_v37, %v603_v37  ;;  %v960_v47 = vpack.c.bf16 %v585_v38, %v585_v38  ;;  %v604_v48 = vmax.f32 %v558_v39, 0.0  ;;  %v586_v49 = vmax.f32 %v486_v40, 0.0 }
  0xfd   : > { %748 = vst.msk [vmem:[%s1211_s29 + $0x28] sm:$0xf] %vm737_vm3, %v962_v42  ;;  %v976_v50 = vpack.c.bf16 %v601_v43, %v601_v43  ;;  %v963_v51 = vpack.c.bf16 %v588_v44, %v588_v44  ;;  %v602_v52 = vmax.f32 %v550_v45, 0.0 }
  0xfe   : > { %764 = vst.msk [vmem:[%s1211_s29 + $0x68] sm:$0xf] %vm737_vm3, %v978_v46  ;;  %746 = vst.msk [vmem:[%s1211_s29 + $0x20] sm:$0xf] %vm737_vm3, %v960_v47  ;;  %v979_v53 = vpack.c.bf16 %v604_v48, %v604_v48  ;;  %v961_v54 = vpack.c.bf16 %v586_v49, %v586_v49  ;;  %v1020_v55 = vpop.f32.mrb[12].mxu0 }
  0xff   : > { %762 = vst.msk [vmem:[%s1211_s29 + $0x60] sm:$0xf] %vm737_vm3, %v976_v50  ;;  %749 = vst.msk [vmem:[%s1211_s29 + $0x2c] sm:$0xf] %vm737_vm3, %v963_v51  ;;  %v977_v56 = vpack.c.bf16 %v602_v52, %v602_v52  ;;  %v507_v57 = vadd.f32 %v1020_v55, %v1199_v22  ;;  %v1036_v58 = vpop.f32.mrb[12].mxu1  ;;  %v498_v59 = vpop.f32.mrb[13].mxu0 }
 0x100   : > { %765 = vst.msk [vmem:[%s1211_s29 + $0x6c] sm:$0xf] %vm737_vm3, %v979_v53  ;;  %747 = vst.msk [vmem:[%s1211_s29 + $0x24] sm:$0xf] %vm737_vm3, %v961_v54  ;;  %v571_v60 = vadd.f32 %v1036_v58, %v1199_v22  ;;  %v499_v61 = vadd.f32 %v1199_v22, %v498_v59  ;;  %v562_v62 = vpop.f32.mrb[13].mxu1  ;;  %v1021_v63 = vpop.f32.mrb[14].mxu0 }
 0x101   : > { %763 = vst.msk [vmem:[%s1211_s29 + $0x64] sm:$0xf] %vm737_vm3, %v977_v56  ;;  %v591_v0 = vmax.f32 %v507_v57, 0.0  ;;  %v563_v1 = vadd.f32 %v1199_v22, %v562_v62  ;;  %v510_v2 = vadd.f32 %v1021_v63, %v1199_v22  ;;  %v1037_v3 = vpop.f32.mrb[14].mxu1  ;;  %v501_v4 = vpop.f32.mrb[15].mxu0 }
 0x102   : > { %v607_v5 = vmax.f32 %v571_v60, 0.0  ;;  %v589_v6 = vmax.f32 %v499_v61, 0.0  ;;  %v574_v7 = vadd.f32 %v1037_v3, %v1199_v22  ;;  %v502_v8 = vadd.f32 %v1199_v22, %v501_v4  ;;  %v565_v9 = vpop.f32.mrb[15].mxu1 }
 0x103   : > { %v966_v10 = vpack.c.bf16 %v591_v0, %v591_v0  ;;  %v605_v11 = vmax.f32 %v563_v1, 0.0  ;;  %v592_v12 = vmax.f32 %v510_v2, 0.0  ;;  %v566_v13 = vadd.f32 %v1199_v22, %v565_v9 }
 0x104   : > { %v982_v14 = vpack.c.bf16 %v607_v5, %v607_v5  ;;  %v964_v15 = vpack.c.bf16 %v589_v6, %v589_v6  ;;  %v608_v16 = vmax.f32 %v574_v7, 0.0  ;;  %v590_v17 = vmax.f32 %v502_v8, 0.0 }
 0x105   : > { %752 = vst.msk [vmem:[%s1211_s29 + $0x38] sm:$0xf] %vm737_vm3, %v966_v10  ;;  %v980_v18 = vpack.c.bf16 %v605_v11, %v605_v11  ;;  %v967_v19 = vpack.c.bf16 %v592_v12, %v592_v12  ;;  %v606_v20 = vmax.f32 %v566_v13, 0.0 }
 0x106   : > { %768 = vst.msk [vmem:[%s1211_s29 + $0x78] sm:$0xf] %vm737_vm3, %v982_v14  ;;  %750 = vst.msk [vmem:[%s1211_s29 + $0x30] sm:$0xf] %vm737_vm3, %v964_v15  ;;  %v983_v21 = vpack.c.bf16 %v608_v16, %v608_v16  ;;  %v965_v23 = vpack.c.bf16 %v590_v17, %v590_v17 }
 0x107   : > { %766 = vst.msk [vmem:[%s1211_s29 + $0x70] sm:$0xf] %vm737_vm3, %v980_v18  ;;  %753 = vst.msk [vmem:[%s1211_s29 + $0x3c] sm:$0xf] %vm737_vm3, %v967_v19  ;;  %v981_v22 = vpack.c.bf16 %v606_v20, %v606_v20 }
 0x108   : > { %769 = vst.msk [vmem:[%s1211_s29 + $0x7c] sm:$0xf] %vm737_vm3, %v983_v21  ;;  %751 = vst.msk [vmem:[%s1211_s29 + $0x34] sm:$0xf] %vm737_vm3, %v965_v23 }
 0x109   : > { %767 = vst.msk [vmem:[%s1211_s29 + $0x74] sm:$0xf] %vm737_vm3, %v981_v22 }
 0x10a PF: > { %s13_s14 = sadd.s32 1, %s1107_s14   ;;  %s1317_s12 = smov %s1103_s13 }
 0x10b   : > { %p10_p5 = scmp.ge.s32.totalorder %s13_s14, 6   ;;  %s1318_s13 = smov %s1320_s15 }
 0x10d   :  { %12 = sbr.rel (!%p10_p5) target bundleno = 2 (0x2), region = 68 }

</bundles_post_ra>
